<compile_context>
chip_gen: v7x
topology: tpu7x:2x2x1
jax: 0.10.0
libtpu: 0.0.40
codegen_flags: <defaults>
</compile_context>

<pallas_src>
import functools
import math

import jax
import jax.numpy as jnp
from jax.experimental import pallas as pl
from jax.experimental.pallas import tpu as pltpu


def _kernel(x_ref, wbd_ref, b_ref, gamma_ref, beta_ref, o_ref, *, eps):
    """One grid step = one half of the channels, fully lane-dense.

    x_ref:     (C2, R, LW)   packed input  (LW = PACK * in_features = 128)
    wbd_ref:   (LW, LW)      block-diagonal kron(I_PACK, W^T)
    b_ref:     (1, LW)       bias tiled PACK times
    gamma_ref: (C2, 1, 1)    BN affine scale (per channel)
    beta_ref:  (C2, 1, 1)    BN affine shift (per channel)
    o_ref:     (C2, R, LW)   packed output
    """
    c2, r, lw = x_ref.shape

    # Linear on the last dim, all channels of this block in a single MXU matmul.
    x2d = x_ref[...].reshape(c2 * r, lw)
    y2d = jnp.dot(x2d, wbd_ref[...], preferred_element_type=jnp.float32)
    y2d = y2d + b_ref[...]                        # (1, LW) broadcast over sublanes
    y = y2d.reshape(c2, r, lw)

    # Per-channel batch statistics (biased variance), one pass: sum & sum-of-squares.
    # Lane reduce first (keepdims), then finish on sublanes.
    s1 = jnp.sum(jnp.sum(y, axis=2, keepdims=True), axis=1, keepdims=True)       # (C2,1,1)
    s2 = jnp.sum(jnp.sum(y * y, axis=2, keepdims=True), axis=1, keepdims=True)   # (C2,1,1)
    inv_n = 1.0 / (r * lw)                        # elements per channel = N*H*out_features
    mean = s1 * inv_n
    var = s2 * inv_n - mean * mean
    inv = jax.lax.rsqrt(var + eps)

    scale = gamma_ref[...] * inv                  # (C2,1,1)
    shift = beta_ref[...] - mean * scale          # (C2,1,1)
    o_ref[...] = (y * scale + shift).astype(o_ref.dtype)


def linear_batchnorm2d(x, w, b, gamma, beta, eps=1e-5):
    """x: (N, C, H, W) float32 with W == in_features == 32, C == num_features == 32."""
    n, c, h, w_in = x.shape
    out_f, in_f = w.shape
    assert w_in == in_f and in_f == out_f

    # Pack PACK consecutive rows into the lane axis so the last dim is a full 128 lanes.
    pack = max(1, 128 // in_f)                    # 4 for the 32-feature Linear
    assert (n * h) % pack == 0, "N*H must be divisible by the lane-pack factor"
    lw = pack * in_f                              # 128
    r = (n * h) // pack

    # Channel-major, lane-dense packing (wrapper-side layout plumbing only).
    xp = jnp.transpose(x, (1, 0, 2, 3)).reshape(c, r, lw)

    wbd = jnp.kron(jnp.eye(pack, dtype=w.dtype), w.T)   # (LW, LW) block-diag of W^T
    bw = jnp.tile(b, pack).reshape(1, lw)
    g3 = gamma.reshape(c, 1, 1)
    be3 = beta.reshape(c, 1, 1)

    csplit = 2 if c % 2 == 0 else 1               # 2-way parallel axis for v7x megacore
    c_blk = c // csplit

    kernel = functools.partial(_kernel, eps=eps)

    out_p = pl.pallas_call(
        kernel,
        out_shape=jax.ShapeDtypeStruct((c, r, lw), x.dtype),
        grid=(csplit,),
        in_specs=[
            pl.BlockSpec((c_blk, r, lw), lambda i: (i, 0, 0)),
            pl.BlockSpec((lw, lw), lambda i: (0, 0)),
            pl.BlockSpec((1, lw), lambda i: (0, 0)),
            pl.BlockSpec((c_blk, 1, 1), lambda i: (i, 0, 0)),
            pl.BlockSpec((c_blk, 1, 1), lambda i: (i, 0, 0)),
        ],
        out_specs=pl.BlockSpec((c_blk, r, lw), lambda i: (i, 0, 0)),
        compiler_params=pltpu.CompilerParams(
            dimension_semantics=("parallel",)),
        cost_estimate=pl.CostEstimate(
            flops=2 * c * r * lw * lw,            # block-diagonal matmul
            transcendentals=c,                    # one rsqrt per channel
            bytes_accessed=(2 * c * r * lw + lw * lw + lw + 2 * c) * 4),
    )(xp, wbd, bw, g3, be3)

    # Unpack back to NCHW.
    return jnp.transpose(out_p.reshape(c, n, h, out_f), (1, 0, 2, 3))


def reference(x, w, b, gamma, beta, eps=1e-5):
    y = jnp.matmul(x, w.T) + b                    # Linear on last dim
    mean = jnp.mean(y, axis=(0, 2, 3), keepdims=True)
    var = jnp.mean((y - mean) ** 2, axis=(0, 2, 3), keepdims=True)
    yhat = (y - mean) / jnp.sqrt(var + eps)
    return yhat * gamma.reshape(1, -1, 1, 1) + beta.reshape(1, -1, 1, 1)


if __name__ == "__main__":
    key = jax.random.PRNGKey(0)
    kx, kw, kb = jax.random.split(key, 3)

    IN_F = OUT_F = 32          # Linear(32, 32)
    C = 32                     # BatchNorm2d(32)
    N, H = 1, 32               # module's own example input is (1, 32, 32, 32)

    # PyTorch nn.Linear default init: U(-1/sqrt(fan_in), 1/sqrt(fan_in))
    bound = 1.0 / math.sqrt(IN_F)
    w = jax.random.uniform(kw, (OUT_F, IN_F), jnp.float32, -bound, bound)
    b = jax.random.uniform(kb, (OUT_F,), jnp.float32, -bound, bound)
    # PyTorch nn.BatchNorm2d default affine init
    gamma = jnp.ones((C,), jnp.float32)
    beta = jnp.zeros((C,), jnp.float32)

    x = jax.random.normal(kx, (N, C, H, IN_F), jnp.float32)

    out = jax.jit(linear_batchnorm2d)(x, w, b, gamma, beta)
    out = jax.block_until_ready(out)

    ref = reference(x, w, b, gamma, beta)
    assert out.shape == ref.shape and out.dtype == ref.dtype
    err = float(jnp.max(jnp.abs(out - ref)))
    assert jnp.allclose(out, ref, atol=1e-4, rtol=1e-4), err
    print("KERNEL_OK")
</pallas_src>

<mosaic_0001>
module attributes {stable_mosaic.version = 11 : i64} {
  func.func @_kernel(%arg0: i32, %arg1: memref<16x8x128xf32, #tpu.memory_space<vmem>>, %arg2: memref<128x128xf32, #tpu.memory_space<vmem>>, %arg3: memref<1x128xf32, #tpu.memory_space<vmem>>, %arg4: memref<16x1x1xf32, #tpu.memory_space<vmem>>, %arg5: memref<16x1x1xf32, #tpu.memory_space<vmem>>, %arg6: memref<16x8x128xf32, #tpu.memory_space<vmem>>) attributes {dimension_semantics = [#tpu.dimension_semantics<parallel>], iteration_bounds = array<i64: 2>, scalar_prefetch = 0 : i64, scratch_operands = 0 : i64, tpu.core_type = #tpu.core_type<tc>, window_params = [{transform_indices = @transform_0, window_bounds = array<i64: 16, 8, 128>}, {pipeline_mode = #tpu.pipeline_mode<synchronous>, transform_indices = @transform_1, window_bounds = array<i64: 128, 128>}, {pipeline_mode = #tpu.pipeline_mode<synchronous>, transform_indices = @transform_2, window_bounds = array<i64: 1, 128>}, {transform_indices = @transform_3, window_bounds = array<i64: 16, 1, 1>}, {transform_indices = @transform_4, window_bounds = array<i64: 16, 1, 1>}, {transform_indices = @transform_5, window_bounds = array<i64: 16, 8, 128>}]} {
    %c0 = arith.constant 0 : index
    %c0_0 = arith.constant 0 : index
    %c0_1 = arith.constant 0 : index
    %0 = vector.load %arg1[%c0, %c0_0, %c0_1] : memref<16x8x128xf32, #tpu.memory_space<vmem>>, vector<16x8x128xf32>
    %1 = vector.shape_cast %0 : vector<16x8x128xf32> to vector<128x128xf32>
    %c0_2 = arith.constant 0 : index
    %c0_3 = arith.constant 0 : index
    %2 = vector.load %arg2[%c0_2, %c0_3] : memref<128x128xf32, #tpu.memory_space<vmem>>, vector<128x128xf32>
    %cst = arith.constant dense<0.000000e+00> : vector<128x128xf32>
    %3 = tpu.matmul %1, %2, %cst {dimension_numbers = #tpu.dot_dimension_numbers<[1], [0], [0], [1], [0, 0, 1, 1], [], []>} : vector<128x128xf32>, vector<128x128xf32>, vector<128x128xf32> -> vector<128x128xf32>
    %c0_4 = arith.constant 0 : index
    %c0_5 = arith.constant 0 : index
    %4 = vector.load %arg3[%c0_4, %c0_5] : memref<1x128xf32, #tpu.memory_space<vmem>>, vector<1x128xf32>
    %5 = vector.broadcast %4 : vector<1x128xf32> to vector<128x128xf32>
    %6 = arith.addf %3, %5 : vector<128x128xf32>
    %7 = vector.shape_cast %6 : vector<128x128xf32> to vector<16x8x128xf32>
    %cst_6 = arith.constant dense<0.000000e+00> : vector<16x8xf32>
    %8 = vector.multi_reduction <add>, %7, %cst_6 [2] : vector<16x8x128xf32> to vector<16x8xf32>
    %9 = vector.shape_cast %8 : vector<16x8xf32> to vector<16x8x1xf32>
    %cst_7 = arith.constant dense<0.000000e+00> : vector<16x1xf32>
    %10 = vector.multi_reduction <add>, %9, %cst_7 [1] : vector<16x8x1xf32> to vector<16x1xf32>
    %11 = vector.shape_cast %10 : vector<16x1xf32> to vector<16x1x1xf32>
    %12 = arith.mulf %7, %7 : vector<16x8x128xf32>
    %cst_8 = arith.constant dense<0.000000e+00> : vector<16x8xf32>
    %13 = vector.multi_reduction <add>, %12, %cst_8 [2] : vector<16x8x128xf32> to vector<16x8xf32>
    %14 = vector.shape_cast %13 : vector<16x8xf32> to vector<16x8x1xf32>
    %cst_9 = arith.constant dense<0.000000e+00> : vector<16x1xf32>
    %15 = vector.multi_reduction <add>, %14, %cst_9 [1] : vector<16x8x1xf32> to vector<16x1xf32>
    %16 = vector.shape_cast %15 : vector<16x1xf32> to vector<16x1x1xf32>
    %cst_10 = arith.constant 9.765625E-4 : f32
    %17 = vector.broadcast %cst_10 : f32 to vector<16x1x1xf32>
    %18 = arith.mulf %11, %17 : vector<16x1x1xf32>
    %cst_11 = arith.constant 9.765625E-4 : f32
    %19 = vector.broadcast %cst_11 : f32 to vector<16x1x1xf32>
    %20 = arith.mulf %16, %19 : vector<16x1x1xf32>
    %21 = arith.mulf %18, %18 : vector<16x1x1xf32>
    %22 = arith.subf %20, %21 : vector<16x1x1xf32>
    %cst_12 = arith.constant 9.99999974E-6 : f32
    %23 = vector.broadcast %cst_12 : f32 to vector<16x1x1xf32>
    %24 = arith.addf %22, %23 : vector<16x1x1xf32>
    %25 = math.rsqrt %24 : vector<16x1x1xf32>
    %c0_13 = arith.constant 0 : index
    %c0_14 = arith.constant 0 : index
    %c0_15 = arith.constant 0 : index
    %26 = vector.load %arg4[%c0_13, %c0_14, %c0_15] : memref<16x1x1xf32, #tpu.memory_space<vmem>>, vector<16x1x1xf32>
    %27 = arith.mulf %26, %25 : vector<16x1x1xf32>
    %c0_16 = arith.constant 0 : index
    %c0_17 = arith.constant 0 : index
    %c0_18 = arith.constant 0 : index
    %28 = vector.load %arg5[%c0_16, %c0_17, %c0_18] : memref<16x1x1xf32, #tpu.memory_space<vmem>>, vector<16x1x1xf32>
    %29 = arith.mulf %18, %27 : vector<16x1x1xf32>
    %30 = arith.subf %28, %29 : vector<16x1x1xf32>
    %31 = vector.broadcast %27 : vector<16x1x1xf32> to vector<16x8x128xf32>
    %32 = arith.mulf %7, %31 : vector<16x8x128xf32>
    %33 = vector.broadcast %30 : vector<16x1x1xf32> to vector<16x8x128xf32>
    %34 = arith.addf %32, %33 : vector<16x8x128xf32>
    %c0_19 = arith.constant 0 : index
    %c0_20 = arith.constant 0 : index
    %c0_21 = arith.constant 0 : index
    %35 = vector.load %arg6[%c0_19, %c0_20, %c0_21] : memref<16x8x128xf32, #tpu.memory_space<vmem>>, vector<16x8x128xf32>
    tpu.vector_store %arg6[%c0_19, %c0_20, %c0_21], %34 {strides = array<i32>} : memref<16x8x128xf32, #tpu.memory_space<vmem>>, vector<16x8x128xf32>,
    return
  }
  func.func @transform_0(%arg0: i32) -> (i32, i32, i32) {
    %c0_i32 = arith.constant 0 : i32
    %c0_i32_0 = arith.constant 0 : i32
    %c0_i32_1 = arith.constant 0 : i32
    return %arg0, %c0_i32, %c0_i32_0 : i32, i32, i32
  }
  func.func @transform_1(%arg0: i32) -> (i32, i32) {
    %c0_i32 = arith.constant 0 : i32
    %c0_i32_0 = arith.constant 0 : i32
    %c0_i32_1 = arith.constant 0 : i32
    return %c0_i32, %c0_i32_0 : i32, i32
  }
  func.func @transform_2(%arg0: i32) -> (i32, i32) {
    %c0_i32 = arith.constant 0 : i32
    %c0_i32_0 = arith.constant 0 : i32
    %c0_i32_1 = arith.constant 0 : i32
    return %c0_i32, %c0_i32_0 : i32, i32
  }
  func.func @transform_3(%arg0: i32) -> (i32, i32, i32) {
    %c0_i32 = arith.constant 0 : i32
    %c0_i32_0 = arith.constant 0 : i32
    %c0_i32_1 = arith.constant 0 : i32
    return %arg0, %c0_i32, %c0_i32_0 : i32, i32, i32
  }
  func.func @transform_4(%arg0: i32) -> (i32, i32, i32) {
    %c0_i32 = arith.constant 0 : i32
    %c0_i32_0 = arith.constant 0 : i32
    %c0_i32_1 = arith.constant 0 : i32
    return %arg0, %c0_i32, %c0_i32_0 : i32, i32, i32
  }
  func.func @transform_5(%arg0: i32) -> (i32, i32, i32) {
    %c0_i32 = arith.constant 0 : i32
    %c0_i32_0 = arith.constant 0 : i32
    %c0_i32_1 = arith.constant 0 : i32
    return %arg0, %c0_i32, %c0_i32_0 : i32, i32, i32
  }
}

</mosaic_0001>

<bundles_post_ra>
// kernel: tile.8
= control target key start
LH: loop header
LB: loop body
LE: loop exit
PB: predicated region body
PF: predicated region fallthrough
CT: control target
= control target key end

     0   :  { %s22_s0 = inlined_call_operand.vmem [shape: f32[32], index: 0, kind: input, shape index: {}]   ;;  %s23_s1 = inlined_call_operand.vmem [shape: f32[4,32], index: 1, kind: output, shape index: {}]  }
   0x1   :  { %v4_v0 = vld [vmem:[%s22_s0] ss:$0 sm:$0xff] }
   0x2   :  { %5 = vst [vmem:[%s23_s1] sm:$0xf] %v4_v0 }

// kernel: tile.9
= control target key start
LH: loop header
LB: loop body
LE: loop exit
PB: predicated region body
PF: predicated region fallthrough
CT: control target
= control target key end

     0   :  { %vm7_vm0 = vcmask 261120   ;;  %s37_s8 = smov 32   ;;  %s38_s9 = smov 64   ;;  %vm13_vm1 = vcmask 1048320   ;;  %vm19_vm2 = vcmask 785920   ;;  %vm25_vm3 = vcmask 523520   ;;  %s55_s0 = inlined_call_operand.vmem [shape: f32[4,32], index: 0, kind: input, shape index: {}]   ;;  %s56_s1 = inlined_call_operand.vmem [shape: f32[1,128], index: 1, kind: output, shape index: {}]  }
   0x1   :  { %v4_v0 = vld [vmem:[%s55_s0] sm:$0xf]  ;;  %s36_s0 = smov 96  }
   0x2   :  { %5 = vst [vmem:[#allocation1] sm:$0xf] %v4_v0 }
   0x9   :  { %v10_v1 = vld [vmem:[#allocation1 + $0x3] sm:$0x1]   ;;  %v22_v2 = vld [vmem:[#allocation1 + $0x1] sm:$0x1]   ;;  %v6_v3 = vld [vmem:[#allocation1] sm:$0x1]  }
   0xa   :  { %11 = vrot.lane.b32.xlu0 %v10_v1, %s36_s0  ;;  %23 = vrot.lane.b32.xlu1 %v22_v2, %s37_s8  ;;  %v16_v4 = vld [vmem:[#allocation1 + $0x2] sm:$0x1]   ;;  %8 = vst.msk [vmem:[#allocation0] sm:$0x1] %vm7_vm0, %v6_v3  }
   0xe   :  { %17 = vrot.lane.b32.xlu0 %v16_v4, %s38_s9 }
  0x7c   :  { %v12_v5 = vpop.permute.xlu0 %11   ;;  %v24_v6 = vpop.permute.xlu1 %23  }
  0x7d   :  { %14 = vst.msk [vmem:[#allocation0] sm:$0x1] %vm13_vm1, %v12_v5  }
  0x80   :  { %v18_v7 = vpop.permute.xlu0 %17  }
  0x81   :  { %20 = vst.msk [vmem:[#allocation0] sm:$0x1] %vm19_vm2, %v18_v7  }
  0x82   :  { %26 = vst.msk [vmem:[#allocation0] sm:$0x1] %vm25_vm3, %v24_v6  }
  0x89   :  { %v30_v8 = vld [vmem:[#allocation0] sm:$0x1] }
  0x8a   :  { %32 = vst [vmem:[%s56_s1] sm:$0x1] %v30_v8 }

// kernel: linear_batchnorm2d.1
= control target key start
LH: loop header
LB: loop body
LE: loop exit
PB: predicated region body
PF: predicated region fallthrough
CT: control target
= control target key end

     0   :  { %s1540_s18 = smov 0   ;;  %s1986_s0 = inlined_call_operand.vmem [shape: f32[32,8,128], index: 0, kind: input, shape index: {}]   ;;  %s1987_s1 = inlined_call_operand.vmem [shape: f32[128,128], index: 1, kind: input, shape index: {}]   ;;  %s1988_s2 = inlined_call_operand.vmem [shape: f32[1,128], index: 2, kind: input, shape index: {}]   ;;  %s1989_s3 = inlined_call_operand.vmem [shape: f32[32,1,1], index: 3, kind: input, shape index: {}]   ;;  %s1990_s4 = inlined_call_operand.vmem [shape: f32[32,1,1], index: 4, kind: input, shape index: {}]   ;;  %s1991_s5 = inlined_call_operand.vmem [shape: f32[32,8,128], index: 5, kind: output, shape index: {}]  }
   0x1 LB: > { %s1308_s19 = sadd.s32 4294967295, %s1507_s18   ;;  %p1312_p0 = scmp.ge.s32.totalorder %s1507_s18, 1  ;;  %s1507_s18 = sphi %s1540_s18, %s15_s18  }
   0x2   : > { %p208_p1 = scmp.lt.s32.totalorder %s1507_s18, 3 }
   0x4   : > { %p209_p2 = pnand %p1312_p0, %p208_p1 }
   0x6   : > { %212 = sbr.rel (%p209_p2) target bundleno = 669 (0x29d), region = 40 }
   0xd   : > { %v282_v0 = vld [vmem:[%s1987_s1] sm:$0xff]  ;;  %v283_v1 = vld [vmem:[%s1987_s1 + $0x8] sm:$0xff]  ;;  %v284_v2 = vld [vmem:[%s1987_s1 + $0x10] sm:$0xff]  ;;  %s1313_s26 = sshll.u32 %s1308_s19, 4 }
   0xe   : > { %v1410_v3 = vpack.c.bf16 %v283_v1, %v282_v0  ;;  %v285_v4 = vld [vmem:[%s1987_s1 + $0x18] sm:$0xff]  ;;  %p245_p3 = scmp.lt.s32.totalorder %s1313_s26, 31  ;;  %v286_v6 = vld [vmem:[%s1987_s1 + $0x20] sm:$0xff]  ;;  %v287_v7 = vld [vmem:[%s1987_s1 + $0x28] sm:$0xff] }
   0xf   : > { %v1414_v5 = vpack.c.bf16 %v285_v4, %v284_v2  ;;  %v1418_v8 = vpack.c.bf16 %v287_v7, %v286_v6  ;;  %v288_v9 = vld [vmem:[%s1987_s1 + $0x30] sm:$0xff]  ;;  %v289_v10 = vld [vmem:[%s1987_s1 + $0x38] sm:$0xff]  ;;  %v290_v14 = vld [vmem:[%s1987_s1 + $0x40] sm:$0xff] }
  0x10   : > { %1411 = vmatprep.subr.bf16.mxu0 %v1410_v3  ;;  %1442 = vmatprep.subr.bf16.mxu1 %v1410_v3  ;;  %s2002_s26 = smov (!%p245_p3, %s1313_s26), 31  ;;  %v1422_v13 = vpack.c.bf16 %v289_v10, %v288_v9  ;;  %v291_v15 = vld [vmem:[%s1987_s1 + $0x48] sm:$0xff]  ;;  %v292_v17 = vld [vmem:[%s1987_s1 + $0x50] sm:$0xff]  ;;  %v293_v18 = vld [vmem:[%s1987_s1 + $0x58] sm:$0xff] }
  0x11   : > { %1413 = vmatpush3.bf16.msra.mxu0 %v1410_v3  ;;  %1450 = vmatpush3.bf16.msra.mxu1 %v1410_v3  ;;  %s1314_s8 = sshll.u32 %s2002_s26, 3  ;;  %v1426_v16 = vpack.c.bf16 %v291_v15, %v290_v14  ;;  %v1430_v19 = vpack.c.bf16 %v293_v18, %v292_v17  ;;  %v294_v20 = vld [vmem:[%s1987_s1 + $0x60] sm:$0xff]  ;;  %v295_v21 = vld [vmem:[%s1987_s1 + $0x68] sm:$0xff]  ;;  %v296_v23 = vld [vmem:[%s1987_s1 + $0x70] sm:$0xff]  ;;  %s1764_s14 = scalar_lea.vmem %s1989_s3, %s2002_s26 }
  0x12   : > { %1415 = vmatprep.subr.bf16.mxu0 %v1414_v5  ;;  %1443 = vmatprep.subr.bf16.mxu1 %v1414_v5  ;;  %s1580_s15 = scalar_lea.vmem %s1986_s0, %s1314_s8  ;;  %v1434_v22 = vpack.c.bf16 %v295_v21, %v294_v20  ;;  %v297_v24 = vld [vmem:[%s1987_s1 + $0x78] sm:$0xff]  ;;  %v1625_v40 = vld [vmem:[%s1988_s2] ss:$0 sm:$0xff]  ;;  %s1823_s17 = scalar_lea.vmem %s1990_s4, %s2002_s26 }
  0x13   : > { %v266_v11 = vld [vmem:[%s1580_s15] sm:$0xff]  ;;  %v1438_v25 = vpack.c.bf16 %v297_v24, %v296_v23  ;;  %v267_v26 = vld [vmem:[%s1580_s15 + $0x8] sm:$0xff]  ;;  %v268_v28 = vld [vmem:[%s1580_s15 + $0x10] sm:$0xff]  ;;  %v1509_v23 = vmov 0   ;;  %s1950_s21 = scalar_lea.vmem %s1991_s5, %s1314_s8 }
  0x14   : > { %v274_v12 = vld [vmem:[%s1580_s15 + $0x40] sm:$0xff]  ;;  %1386 = vmatprep.mubr.f32.mxu0 %v266_v11  ;;  %v275_v27 = vld [vmem:[%s1580_s15 + $0x48] sm:$0xff]  ;;  %v276_v29 = vld [vmem:[%s1580_s15 + $0x50] sm:$0xff]  ;;  %1467 = vset.pattern.permute.xlu1 %v1509_v23 }
  0x15   : > { %1417 = vmatpush3.bf16.msra.mxu0 %v1414_v5  ;;  %1451 = vmatpush3.bf16.msra.mxu1 %v1414_v5  ;;  %v269_v30 = vld [vmem:[%s1580_s15 + $0x18] sm:$0xff]  ;;  %v270_v32 = vld [vmem:[%s1580_s15 + $0x20] sm:$0xff]  ;;  %v271_v34 = vld [vmem:[%s1580_s15 + $0x28] sm:$0xff] }
  0x16   : > { %1419 = vmatprep.subr.bf16.mxu0 %v1418_v8  ;;  %1444 = vmatprep.subr.bf16.mxu1 %v1418_v8  ;;  %v277_v31 = vld [vmem:[%s1580_s15 + $0x58] sm:$0xff]  ;;  %v278_v33 = vld [vmem:[%s1580_s15 + $0x60] sm:$0xff]  ;;  %v279_v35 = vld [vmem:[%s1580_s15 + $0x68] sm:$0xff] }
  0x17   : > { %1398 = vmatprep.mubr.f32.mxu1 %v274_v12  ;;  %v272_v36 = vld [vmem:[%s1580_s15 + $0x30] sm:$0xff]  ;;  %v273_v38 = vld [vmem:[%s1580_s15 + $0x38] sm:$0xff]  ;;  %1468 = vset.pattern.permute.xlu0 %v1509_v23 }
  0x18   : > { %v280_v37 = vld [vmem:[%s1580_s15 + $0x70] sm:$0xff]  ;;  %v281_v39 = vld [vmem:[%s1580_s15 + $0x78] sm:$0xff] }
  0x19   : > { %1421 = vmatpush3.bf16.msra.mxu0 %v1418_v8  ;;  %1452 = vmatpush3.bf16.msra.mxu1 %v1418_v8 }
  0x1a   : > { %1423 = vmatprep.subr.bf16.mxu0 %v1422_v13  ;;  %1445 = vmatprep.subr.bf16.mxu1 %v1422_v13 }
  0x1d   : > { %1425 = vmatpush3.bf16.msra.mxu0 %v1422_v13  ;;  %1453 = vmatpush3.bf16.msra.mxu1 %v1422_v13 }
  0x1e   : > { %1427 = vmatprep.subr.bf16.mxu0 %v1426_v16  ;;  %1446 = vmatprep.subr.bf16.mxu1 %v1426_v16 }
  0x21   : > { %1429 = vmatpush3.bf16.msra.mxu0 %v1426_v16  ;;  %1454 = vmatpush3.bf16.msra.mxu1 %v1426_v16 }
  0x22   : > { %1431 = vmatprep.subr.bf16.mxu0 %v1430_v19  ;;  %1447 = vmatprep.subr.bf16.mxu1 %v1430_v19 }
  0x25   : > { %1433 = vmatpush3.bf16.msra.mxu0 %v1430_v19  ;;  %1455 = vmatpush3.bf16.msra.mxu1 %v1430_v19 }
  0x26   : > { %1435 = vmatprep.subr.bf16.mxu0 %v1434_v22  ;;  %1448 = vmatprep.subr.bf16.mxu1 %v1434_v22 }
  0x29   : > { %1437 = vmatpush3.bf16.msra.mxu0 %v1434_v22  ;;  %1456 = vmatpush3.bf16.msra.mxu1 %v1434_v22 }
  0x2a   : > { %1439 = vmatprep.subr.bf16.mxu0 %v1438_v25  ;;  %1449 = vmatprep.subr.bf16.mxu1 %v1438_v25 }
  0x2d   : > { %1441 = vmatpush3.bf16.msra.mxu0 %v1438_v25  ;;  %1457 = vmatpush3.bf16.msra.mxu1 %v1438_v25 }
  0x30   : > { %1387 = vmatmul.mubr.f32.vlgmr.msra.gmra.mrb[0].mxu0 %v267_v26  ;;  %1399 = vmatmul.mubr.f32.vlgmr.msra.gmra.mrb[0].mxu1 %v275_v27 }
  0x31   : > { %1389 = vmatprep.mubr.f32.mxu0 %v268_v28  ;;  %1401 = vmatprep.mubr.f32.mxu1 %v276_v29 }
  0x34   : > { %1390 = vmatmul.mubr.f32.gmra.mrb[2].mxu0 %v269_v30  ;;  %1402 = vmatmul.mubr.f32.gmra.mrb[2].mxu1 %v277_v31 }
  0x35   : > { %1392 = vmatprep.mubr.f32.mxu0 %v270_v32  ;;  %1404 = vmatprep.mubr.f32.mxu1 %v278_v33 }
  0x38   : > { %1393 = vmatmul.mubr.f32.gmra.mrb[4].mxu0 %v271_v34  ;;  %1405 = vmatmul.mubr.f32.gmra.mrb[4].mxu1 %v279_v35  ;;  %v914_v34 = vlaneseq }
  0x39   : > { %1395 = vmatprep.mubr.f32.mxu0 %v272_v36  ;;  %1407 = vmatprep.mubr.f32.mxu1 %v280_v37 }
  0x3c   : > { %1396 = vmatmul.mubr.f32.gmra.mrb[6].mxu0 %v273_v38  ;;  %1408 = vmatmul.mubr.f32.gmra.mrb[6].mxu1 %v281_v39 }
 0x103   : > { %v1388_v41 = vpop.f32.mrb[0].mxu0  ;;  %v1400_v42 = vpop.f32.mrb[0].mxu1 }
 0x104   : > { %v1628_v43 = vadd.f32 %v1388_v41, %v1625_v40  ;;  %v1631_v44 = vadd.f32 %v1400_v42, %v1625_v40  ;;  %v411_v45 = vpop.f32.mrb[1].mxu1  ;;  %v371_v46 = vpop.f32.mrb[1].mxu0 }
 0x105   : > { %v1638_v50 = vadd.f32 %v1625_v40, %v371_v46  ;;  %v1642_v55 = vadd.f32 %v1625_v40, %v411_v45 }
 0x106   : > { %468 = vadd.xlane.f32.xlu1 %v1631_v44  ;;  %452 = vadd.xlane.f32.xlu0 %v1628_v43  ;;  %v579_v47 = vmul.f32 %v1628_v43, %v1628_v43  ;;  %v587_v56 = vmul.f32 %v1631_v44, %v1631_v44 }
 0x107   : > { %v1391_v48 = vpop.f32.mrb[2].mxu0  ;;  %v1403_v49 = vpop.f32.mrb[2].mxu1  ;;  %v578_v62 = vmul.f32 %v1638_v50, %v1638_v50  ;;  %v586_v2 = vmul.f32 %v1642_v55, %v1642_v55 }
 0x108   : > { %v381_v51 = vpop.f32.mrb[3].mxu0  ;;  %v421_v52 = vpop.f32.mrb[3].mxu1  ;;  %v1647_v59 = vadd.f32 %v1391_v48, %v1625_v40  ;;  %v1653_v1 = vadd.f32 %v1403_v49, %v1625_v40 }
 0x109   : > { %v1660_v3 = vadd.f32 %v1625_v40, %v381_v51  ;;  %v1663_v4 = vadd.f32 %v1625_v40, %v421_v52 }
 0x10a   : > { %596 = vadd.xlane.f32.xlu1 %v579_v47  ;;  %450 = vadd.xlane.f32.xlu0 %v1638_v50  ;;  %v581_v5 = vmul.f32 %v1647_v59, %v1647_v59  ;;  %v589_v7 = vmul.f32 %v1653_v1, %v1653_v1  ;;  %v915_v47 = vshrl.u32 %v914_v34, 7 }
 0x10b   : > { %v1394_v53 = vpop.f32.mrb[4].mxu0  ;;  %v1406_v54 = vpop.f32.mrb[4].mxu1  ;;  %v580_v6 = vmul.f32 %v1660_v3, %v1660_v3  ;;  %v588_v8 = vmul.f32 %v1663_v4, %v1663_v4 }
 0x10c   : > { %v391_v57 = vpop.f32.mrb[5].mxu0  ;;  %v431_v58 = vpop.f32.mrb[5].mxu1  ;;  %v1676_v9 = vadd.f32 %v1394_v53, %v1625_v40  ;;  %v1682_v11 = vadd.f32 %v1406_v54, %v1625_v40 }
 0x10d   : > { %v1679_v10 = vadd.f32 %v1625_v40, %v391_v57  ;;  %v1687_v12 = vadd.f32 %v1625_v40, %v431_v58 }
 0x10e   : > { %612 = vadd.xlane.f32.xlu1 %v587_v56  ;;  %466 = vadd.xlane.f32.xlu0 %v1642_v55  ;;  %v583_v13 = vmul.f32 %v1676_v9, %v1676_v9  ;;  %v591_v15 = vmul.f32 %v1682_v11, %v1682_v11 }
 0x10f   : > { %v1397_v60 = vpop.f32.mrb[6].mxu0  ;;  %v1409_v61 = vpop.f32.mrb[6].mxu1  ;;  %1995 = vst [vmem:[#allocation2_spill] sm:$0xff] %v1687_v12  ;;  %v582_v14 = vmul.f32 %v1679_v10, %v1679_v10  ;;  %v590_v16 = vmul.f32 %v1687_v12, %v1687_v12 }
 0x110   : > { %v401_v63 = vpop.f32.mrb[7].mxu0  ;;  %v441_v0 = vpop.f32.mrb[7].mxu1  ;;  %v1700_v17 = vadd.f32 %v1397_v60, %v1625_v40  ;;  %v1706_v19 = vadd.f32 %v1409_v61, %v1625_v40 }
 0x111   : > { %v1703_v18 = vadd.f32 %v1625_v40, %v401_v63  ;;  %v1711_v20 = vadd.f32 %v1625_v40, %v441_v0 }
 0x112   : > { %456 = vadd.xlane.f32.xlu1 %v1647_v59  ;;  %594 = vadd.xlane.f32.xlu0 %v578_v62  ;;  %v585_v21 = vmul.f32 %v1700_v17, %v1700_v17  ;;  %v593_v24 = vmul.f32 %v1706_v19, %v1706_v19 }
 0x113   : > { %1996 = vst [vmem:[#allocation3_spill] sm:$0xff] %v1703_v18  ;;  %1997 = vst [vmem:[#allocation4_spill] sm:$0xff] %v1711_v20  ;;  %v584_v22 = vmul.f32 %v1703_v18, %v1703_v18  ;;  %v592_v25 = vmul.f32 %v1711_v20, %v1711_v20 }
 0x116   : > { %472 = vadd.xlane.f32.xlu1 %v1653_v1  ;;  %610 = vadd.xlane.f32.xlu0 %v586_v2 }
 0x11a   : > { %454 = vadd.xlane.f32.xlu1 %v1660_v3  ;;  %470 = vadd.xlane.f32.xlu0 %v1663_v4 }
 0x11e   : > { %600 = vadd.xlane.f32.xlu1 %v581_v5  ;;  %598 = vadd.xlane.f32.xlu0 %v580_v6 }
 0x122   : > { %616 = vadd.xlane.f32.xlu1 %v589_v7  ;;  %614 = vadd.xlane.f32.xlu0 %v588_v8  ;;  %v1725_v7 = vsub.s32 0, %v915_v47 }
 0x126   : > { %460 = vadd.xlane.f32.xlu1 %v1676_v9  ;;  %458 = vadd.xlane.f32.xlu0 %v1679_v10 }
 0x12a   : > { %476 = vadd.xlane.f32.xlu1 %v1682_v11  ;;  %474 = vadd.xlane.f32.xlu0 %v1687_v12 }
 0x12e   : > { %604 = vadd.xlane.f32.xlu1 %v583_v13  ;;  %602 = vadd.xlane.f32.xlu0 %v582_v14 }
 0x132   : > { %620 = vadd.xlane.f32.xlu1 %v591_v15  ;;  %618 = vadd.xlane.f32.xlu0 %v590_v16 }
 0x136   : > { %464 = vadd.xlane.f32.xlu1 %v1700_v17  ;;  %462 = vadd.xlane.f32.xlu0 %v1703_v18 }
 0x13a   : > { %480 = vadd.xlane.f32.xlu1 %v1706_v19  ;;  %478 = vadd.xlane.f32.xlu0 %v1711_v20 }
 0x13e   : > { %608 = vadd.xlane.f32.xlu1 %v585_v21  ;;  %606 = vadd.xlane.f32.xlu0 %v584_v22 }
 0x142   : > { %624 = vadd.xlane.f32.xlu1 %v593_v24  ;;  %622 = vadd.xlane.f32.xlu0 %v592_v25 }
 0x193   : > { %v469_v26 = vpop.xlane.xlu1 %468  ;;  %v453_v27 = vpop.xlane.xlu0 %452 }
 0x194   : > { %v536_v28 = vrot.slane %v469_v26, 4  ;;  %v488_v29 = vrot.slane %v453_v27, 4 }
 0x196   : > { %v537_v30 = vadd.f32 %v536_v28, %v469_v26  ;;  %v489_v31 = vadd.f32 %v488_v29, %v453_v27 }
 0x197   : > { %v597_v32 = vpop.xlane.xlu1 %596  ;;  %v451_v33 = vpop.xlane.xlu0 %450 }
 0x198   : > { %v538_v35 = vrot.slane %v537_v30, 2  ;;  %v490_v36 = vrot.slane %v489_v31, 2  ;;  %v632_v37 = vrot.slane %v597_v32, 4  ;;  %v482_v38 = vrot.slane %v451_v33, 4 }
 0x19a   : > { %v539_v39 = vadd.f32 %v538_v35, %v537_v30  ;;  %v491_v40 = vadd.f32 %v490_v36, %v489_v31  ;;  %v633_v41 = vadd.f32 %v632_v37, %v597_v32  ;;  %v483_v42 = vadd.f32 %v482_v38, %v451_v33 }
 0x19b   : > { %v613_v45 = vpop.xlane.xlu1 %612  ;;  %v467_v46 = vpop.xlane.xlu0 %466 }
 0x19c   : > { %v540_v48 = vrot.slane %v539_v39, 1  ;;  %v492_v49 = vrot.slane %v491_v40, 1  ;;  %v634_v51 = vrot.slane %v633_v41, 2  ;;  %v484_v52 = vrot.slane %v483_v42, 2 }
 0x19d   : > { %v680_v53 = vrot.slane %v613_v45, 4  ;;  %v530_v54 = vrot.slane %v467_v46, 4 }
 0x19e   : > { %v541_v56 = vadd.f32 %v540_v48, %v539_v39  ;;  %v493_v57 = vadd.f32 %v492_v49, %v491_v40  ;;  %v635_v58 = vadd.f32 %v634_v51, %v633_v41  ;;  %v485_v60 = vadd.f32 %v484_v52, %v483_v42 }
 0x19f   : > { %v681_v61 = vadd.f32 %v680_v53, %v613_v45  ;;  %v531_v62 = vadd.f32 %v530_v54, %v467_v46  ;;  %v457_v63 = vpop.xlane.xlu1 %456  ;;  %v595_v0 = vpop.xlane.xlu0 %594 }
 0x1a0   : > { %v1723_v2 = vmul.f32 0.0009765625, %v493_v57  ;;  %v636_v5 = vrot.slane %v635_v58, 1  ;;  %v486_v6 = vrot.slane %v485_v60, 1  ;;  %v500_v14 = vrot.slane %v457_v63, 4 }
 0x1a1   : > { %v682_v8 = vrot.slane %v681_v61, 2  ;;  %v532_v13 = vrot.slane %v531_v62, 2  ;;  %v626_v15 = vrot.slane %v595_v0, 4  ;;  %v1727_v16 = vmul.f32 0.0009765625, %v541_v56 }
 0x1a2   : > { %v755_v21 = vmul.f32 %v1723_v2, %v1723_v2  ;;  %v637_v22 = vadd.f32 %v636_v5, %v635_v58  ;;  %v487_v23 = vadd.f32 %v486_v6, %v485_v60  ;;  %v501_v26 = vadd.f32 %v500_v14, %v457_v63 }
 0x1a3   : > { %v683_v24 = vadd.f32 %v682_v8, %v681_v61  ;;  %v533_v25 = vadd.f32 %v532_v13, %v531_v62  ;;  %v627_v27 = vadd.f32 %v626_v15, %v595_v0  ;;  %v473_v28 = vpop.xlane.xlu1 %472  ;;  %v611_v29 = vpop.xlane.xlu0 %610  ;;  %v763_v38 = vmul.f32 %v1727_v16, %v1727_v16 }
 0x1a4   : > { %v739_v30 = vmul.f32 0.0009765625, %v637_v22  ;;  %v1731_v31 = vmul.f32 0.0009765625, %v487_v23  ;;  %v548_v32 = vrot.slane %v473_v28, 4  ;;  %v674_v33 = vrot.slane %v611_v29, 4 }
 0x1a5   : > { %v684_v34 = vrot.slane %v683_v24, 1  ;;  %v534_v35 = vrot.slane %v533_v25, 1  ;;  %v502_v36 = vrot.slane %v501_v26, 2  ;;  %v628_v37 = vrot.slane %v627_v27, 2 }
 0x1a6   : > { %v771_v39 = vsub.f32 %v739_v30, %v755_v21  ;;  %v549_v40 = vadd.f32 %v548_v32, %v473_v28  ;;  %v675_v41 = vadd.f32 %v674_v33, %v611_v29  ;;  %v754_v56 = vmul.f32 %v1731_v31, %v1731_v31 }
 0x1a7   : > { %v685_v42 = vadd.f32 %v684_v34, %v683_v24  ;;  %v535_v45 = vadd.f32 %v534_v35, %v533_v25  ;;  %v503_v46 = vadd.f32 %v502_v36, %v501_v26  ;;  %v629_v47 = vadd.f32 %v628_v37, %v627_v27  ;;  %v455_v48 = vpop.xlane.xlu1 %454  ;;  %v471_v49 = vpop.xlane.xlu0 %470 }
 0x1a8   : > { %v787_v51 = vadd.f32 1e-05, %v771_v39  ;;  %v550_v52 = vrot.slane %v549_v40, 2  ;;  %v676_v53 = vrot.slane %v675_v41, 2  ;;  %v494_v54 = vrot.slane %v455_v48, 4 }
 0x1a9   : > { %v747_v57 = vmul.f32 0.0009765625, %v685_v42  ;;  %v504_v58 = vrot.slane %v503_v46, 1  ;;  %v630_v60 = vrot.slane %v629_v47, 1  ;;  %v1737_v61 = vmul.f32 0.0009765625, %v535_v45 }
 0x1aa   : > { %v551_v62 = vadd.f32 %v550_v52, %v549_v40  ;;  %v677_v63 = vadd.f32 %v676_v53, %v675_v41  ;;  %v495_v0 = vadd.f32 %v494_v54, %v455_v48  ;;  %1469 = vrsqrt.f32 %v787_v51 }
 0x1ab   : > { %v779_v5 = vsub.f32 %v747_v57, %v763_v38  ;;  %v505_v6 = vadd.f32 %v504_v58, %v503_v46  ;;  %v631_v8 = vadd.f32 %v630_v60, %v629_v47  ;;  %v601_v13 = vpop.xlane.xlu1 %600  ;;  %v599_v14 = vpop.xlane.xlu0 %598  ;;  %v542_v23 = vrot.slane %v471_v49, 4 }
 0x1ac   : > { %v552_v15 = vrot.slane %v551_v62, 1  ;;  %v678_v21 = vrot.slane %v677_v63, 1  ;;  %v496_v22 = vrot.slane %v495_v0, 2  ;;  %v644_v27 = vrot.slane %v601_v13, 4 }
 0x1ad   : > { %v795_v24 = vadd.f32 1e-05, %v779_v5  ;;  %v1739_v25 = vmul.f32 0.0009765625, %v505_v6  ;;  %v738_v26 = vmul.f32 0.0009765625, %v631_v8  ;;  %v543_v32 = vadd.f32 %v542_v23, %v471_v49 }
 0x1ae   : > { %v553_v28 = vadd.f32 %v552_v15, %v551_v62  ;;  %v679_v29 = vadd.f32 %v678_v21, %v677_v63  ;;  %v497_v30 = vadd.f32 %v496_v22, %v495_v0  ;;  %v762_v33 = vmul.f32 %v1737_v61, %v1737_v61 }
 0x1af   : > { %1471 = vrsqrt.f32 %v795_v24  ;;  %v770_v34 = vsub.f32 %v738_v26, %v754_v56  ;;  %v645_v35 = vadd.f32 %v644_v27, %v601_v13  ;;  %v617_v36 = vpop.xlane.xlu1 %616  ;;  %v615_v37 = vpop.xlane.xlu0 %614  ;;  %v544_v41 = vrot.slane %v543_v32, 2 }
 0x1b0   : > { %v1743_v38 = vmul.f32 0.0009765625, %v553_v28  ;;  %v746_v39 = vmul.f32 0.0009765625, %v679_v29  ;;  %v498_v40 = vrot.slane %v497_v30, 1  ;;  %v638_v46 = vrot.slane %v599_v14, 4 }
 0x1b1   : > { %v786_v42 = vadd.f32 1e-05, %v770_v34  ;;  %v646_v45 = vrot.slane %v645_v35, 2  ;;  %v692_v47 = vrot.slane %v617_v36, 4  ;;  %v1747_v48 = vmul.f32 %v1739_v25, %v1739_v25 }
 0x1b2   : > { %v778_v49 = vsub.f32 %v746_v39, %v762_v33  ;;  %v499_v51 = vadd.f32 %v498_v40, %v497_v30  ;;  %v545_v52 = vadd.f32 %v544_v41, %v543_v32  ;;  %v1751_v53 = vmul.f32 %v1743_v38, %v1743_v38 }
 0x1b3   : > { %v647_v54 = vadd.f32 %v646_v45, %v645_v35  ;;  %v639_v56 = vadd.f32 %v638_v46, %v599_v14  ;;  %v693_v57 = vadd.f32 %v692_v47, %v617_v36  ;;  %v461_v58 = vpop.xlane.xlu1 %460  ;;  %v459_v60 = vpop.xlane.xlu0 %458  ;;  %1473 = vrsqrt.f32 %v786_v42 }
 0x1b4   : > { %v794_v62 = vadd.f32 1e-05, %v778_v49  ;;  %v546_v63 = vrot.slane %v545_v52, 1  ;;  %v686_v0 = vrot.slane %v615_v37, 4  ;;  %v1470_v5 = vpop.eup %1469  ;;  %v512_v15 = vrot.slane %v461_v58, 4 }
 0x1b5   : > { %v648_v6 = vrot.slane %v647_v54, 1  ;;  %v640_v8 = vrot.slane %v639_v56, 2  ;;  %v694_v13 = vrot.slane %v693_v57, 2  ;;  %v1753_v21 = vmul.f32 0.0009765625, %v499_v51 }
 0x1b6   : > { %1475 = vrsqrt.f32 %v794_v62  ;;  %v547_v22 = vadd.f32 %v546_v63, %v545_v52  ;;  %v687_v23 = vadd.f32 %v686_v0, %v615_v37  ;;  %v513_v27 = vadd.f32 %v512_v15, %v461_v58 }
 0x1b7   : > { %v649_v24 = vadd.f32 %v648_v6, %v647_v54  ;;  %v641_v26 = vadd.f32 %v640_v8, %v639_v56  ;;  %v695_v14 = vadd.f32 %v694_v13, %v693_v57  ;;  %v477_v28 = vpop.xlane.xlu1 %476  ;;  %v475_v29 = vpop.xlane.xlu0 %474  ;;  %v506_v33 = vrot.slane %v459_v60, 4 }
 0x1b8   : > { %v1755_v30 = vmul.f32 0.0009765625, %v547_v22  ;;  %v688_v32 = vrot.slane %v687_v23, 2  ;;  %v560_v34 = vrot.slane %v477_v28, 4  ;;  %v514_v41 = vrot.slane %v513_v27, 2 }
 0x1b9   : > { %v1472_v35 = vpop.eup %1471  ;;  %v741_v36 = vmul.f32 0.0009765625, %v649_v24  ;;  %v642_v39 = vrot.slane %v641_v26, 1  ;;  %v696_v40 = vrot.slane %v695_v14, 1  ;;  %v756_v37 = vmul.f32 %v1753_v21, %v1753_v21  ;;  %v819_v24 = vld [vmem:[%s1764_s14 + $0x1] sm:$0x1] }
 0x1ba   : > { %v689_v42 = vadd.f32 %v688_v32, %v687_v23  ;;  %v507_v45 = vadd.f32 %v506_v33, %v459_v60  ;;  %v561_v46 = vadd.f32 %v560_v34, %v477_v28  ;;  %v515_v52 = vadd.f32 %v514_v41, %v513_v27 }
 0x1bb   : > { %v773_v47 = vsub.f32 %v741_v36, %v1747_v48  ;;  %v643_v49 = vadd.f32 %v642_v39, %v641_v26  ;;  %v697_v51 = vadd.f32 %v696_v40, %v695_v14  ;;  %v605_v54 = vpop.xlane.xlu1 %604  ;;  %v603_v56 = vpop.xlane.xlu0 %602  ;;  %v554_v63 = vrot.slane %v475_v29, 4 }
 0x1bc   : > { %v690_v57 = vrot.slane %v689_v42, 1  ;;  %v508_v58 = vrot.slane %v507_v45, 2  ;;  %v562_v62 = vrot.slane %v561_v46, 2  ;;  %v764_v60 = vmul.f32 %v1755_v30, %v1755_v30 }
 0x1bd   : > { %v740_v0 = vmul.f32 0.0009765625, %v643_v49  ;;  %v749_v48 = vmul.f32 0.0009765625, %v697_v51  ;;  %v516_v6 = vrot.slane %v515_v52, 1  ;;  %v1474_v8 = vpop.eup %1473  ;;  %v555_v23 = vadd.f32 %v554_v63, %v475_v29 }
 0x1be   : > { %v691_v13 = vadd.f32 %v690_v57, %v689_v42  ;;  %v509_v15 = vadd.f32 %v508_v58, %v507_v45  ;;  %v563_v22 = vadd.f32 %v562_v62, %v561_v46  ;;  %v789_v26 = vadd.f32 1e-05, %v773_v47  ;;  %v827_v46 = vld [vmem:[%s1764_s14 + $0x9] sm:$0x1] }
 0x1bf   : > { %v772_v14 = vsub.f32 %v740_v0, %v756_v37  ;;  %v781_v27 = vsub.f32 %v749_v48, %v1751_v53  ;;  %v517_v28 = vadd.f32 %v516_v6, %v515_v52  ;;  %v621_v32 = vpop.xlane.xlu1 %620  ;;  %v619_v33 = vpop.xlane.xlu0 %618  ;;  %v556_v41 = vrot.slane %v555_v23, 2  ;;  %v818_v0 = vld [vmem:[%s1764_s14] sm:$0x1] }
 0x1c0   : > { %v1476_v34 = vpop.eup %1475  ;;  %v748_v36 = vmul.f32 0.0009765625, %v691_v13  ;;  %v510_v39 = vrot.slane %v509_v15, 1  ;;  %v564_v40 = vrot.slane %v563_v22, 1  ;;  %v1770_v51 = vmul.f32 %v1470_v5, %v819_v24 }
 0x1c1   : > { %v788_v49 = vadd.f32 1e-05, %v772_v14  ;;  %v797_v42 = vadd.f32 1e-05, %v781_v27  ;;  %v1772_v45 = vmul.f32 0.0009765625, %v517_v28  ;;  %v656_v47 = vrot.slane %v605_v54, 4 }
 0x1c2   : > { %v780_v29 = vsub.f32 %v748_v36, %v764_v60  ;;  %v511_v37 = vadd.f32 %v510_v39, %v509_v15  ;;  %v921_v53 = vrot.slane %v1770_v51, %v1725_v7  ;;  %1477 = vrsqrt.f32 %v789_v26 }
 0x1c3   : > { %v565_v52 = vadd.f32 %v564_v40, %v563_v22  ;;  %v557_v57 = vadd.f32 %v556_v41, %v555_v23  ;;  %v465_v58 = vpop.xlane.xlu1 %464  ;;  %1479 = vrsqrt.f32 %v788_v49  ;;  %v657_v62 = vadd.f32 %v656_v47, %v605_v54  ;;  %v463_v60 = vpop.xlane.xlu0 %462  ;;  %v826_v40 = vld [vmem:[%s1764_s14 + $0x8] sm:$0x1] }
 0x1c4   : > { %983 = vperm.xlu1 %1467, %v921_v53   ;;  %v650_v5 = vrot.slane %v603_v56, 4  ;;  %v1777_v63 = vmul.f32 %v1472_v35, %v827_v46  ;;  %1481 = vrsqrt.f32 %v797_v42  ;;  %v796_v48 = vadd.f32 1e-05, %v780_v29 }
 0x1c5   : > { %v1782_v6 = vmul.f32 %v1772_v45, %v1772_v45  ;;  %v704_v13 = vrot.slane %v621_v32, 4  ;;  %v1784_v15 = vmul.f32 0.0009765625, %v511_v37  ;;  %v658_v22 = vrot.slane %v657_v62, 2 }
 0x1c6   : > { %v651_v23 = vadd.f32 %v650_v5, %v603_v56  ;;  %v953_v54 = vrot.slane %v1777_v63, %v1725_v7  ;;  %v698_v35 = vrot.slane %v619_v33, 4  ;;  %v1788_v26 = vmul.f32 %v1474_v8, %v818_v0 }
 0x1c7   : > { %v705_v24 = vadd.f32 %v704_v13, %v621_v32  ;;  %v524_v14 = vrot.slane %v465_v58, 4  ;;  %v558_v27 = vrot.slane %v557_v57, 1  ;;  %v659_v28 = vadd.f32 %v658_v22, %v657_v62  ;;  %v481_v29 = vpop.xlane.xlu1 %480  ;;  %v479_v53 = vpop.xlane.xlu0 %478 }
 0x1c8   : > { %v652_v36 = vrot.slane %v651_v23, 2  ;;  %1015 = vperm.xlu0 %1468, %v953_v54   ;;  %v518_v39 = vrot.slane %v463_v60, 4  ;;  %v699_v49 = vadd.f32 %v698_v35, %v619_v33  ;;  %v917_v42 = vrot.slane %v1788_v26, %v1725_v7 }
 0x1c9   : > { %v706_v41 = vrot.slane %v705_v24, 2  ;;  %v525_v56 = vadd.f32 %v524_v14, %v465_v58  ;;  %v1793_v46 = vmul.f32 0.0009765625, %v565_v52  ;;  %v660_v32 = vrot.slane %v659_v28, 1 }
 0x1ca   : > { %v653_v37 = vadd.f32 %v652_v36, %v651_v23  ;;  %v519_v8 = vadd.f32 %v518_v39, %v463_v60  ;;  %v700_v5 = vrot.slane %v699_v49, 2  ;;  %v1795_v0 = vmul.f32 %v1476_v34, %v826_v40 }
 0x1cb   : > { %v707_v47 = vadd.f32 %v706_v41, %v705_v24  ;;  %v526_v62 = vrot.slane %v525_v56, 2  ;;  %v559_v13 = vadd.f32 %v558_v27, %v557_v57  ;;  %v661_v22 = vadd.f32 %v660_v32, %v659_v28  ;;  %v609_v41 = vpop.xlane.xlu1 %608  ;;  %v607_v32 = vpop.xlane.xlu0 %606 }
 0x1cc   : > { %v654_v54 = vrot.slane %v653_v37, 1  ;;  %979 = vperm.xlu0 %1468, %v917_v42   ;;  %v572_v33 = vrot.slane %v481_v29, 4  ;;  %v1478_v35 = vpop.eup %1477  ;;  %v701_v58 = vadd.f32 %v700_v5, %v699_v49  ;;  %v949_v52 = vrot.slane %v1795_v0, %v1725_v7 }
 0x1cd   : > { %v708_v20 = vrot.slane %v707_v47, 1  ;;  %v527_v14 = vadd.f32 %v526_v62, %v525_v56  ;;  %v1799_v23 = vpop.eup %1479  ;;  %v743_v60 = vmul.f32 0.0009765625, %v661_v22  ;;  %v520_v36 = vrot.slane %v519_v8, 2 }
 0x1ce   : > { %v655_v24 = vadd.f32 %v654_v54, %v653_v37  ;;  %v573_v39 = vadd.f32 %v572_v33, %v481_v29  ;;  %v1482_v34 = vpop.eup %1481  ;;  %v702_v57 = vrot.slane %v701_v58, 1  ;;  %1011 = vperm.xlu1 %1467, %v949_v52   ;;  %v566_v28 = vrot.slane %v479_v53, 4 }
 0x1cf   : > { %v709_v40 = vadd.f32 %v708_v20, %v707_v47  ;;  %v528_v27 = vrot.slane %v527_v14, 1  ;;  %1483 = vrsqrt.f32 %v796_v48  ;;  %v775_v49 = vsub.f32 %v743_v60, %v1782_v6 }
 0x1d0   : > { %v742_v42 = vmul.f32 0.0009765625, %v655_v24  ;;  %v574_v56 = vrot.slane %v573_v39, 2  ;;  %v767_v5 = vmul.f32 %v1793_v46, %v1793_v46  ;;  %v703_v62 = vadd.f32 %v702_v57, %v701_v58  ;;  %v625_v58 = vpop.xlane.xlu1 %624 }
 0x1d1   : > { %v751_v37 = vmul.f32 0.0009765625, %v709_v40  ;;  %v529_v29 = vadd.f32 %v528_v27, %v527_v14  ;;  %v758_v20 = vmul.f32 %v1784_v15, %v1784_v15  ;;  %v1806_v47 = vmul.f32 0.0009765625, %v559_v13  ;;  %v821_v40 = vld [vmem:[%s1764_s14 + $0x3] sm:$0x1] }
 0x1d2   : > { %v791_v22 = vadd.f32 1e-05, %v775_v49  ;;  %v567_v54 = vadd.f32 %v566_v28, %v479_v53  ;;  %v1808_v33 = vadd.f32 %v520_v36, %v519_v8  ;;  %v575_v6 = vadd.f32 %v574_v56, %v573_v39  ;;  %v623_v53 = vpop.xlane.xlu0 %622  ;;  %v829_v56 = vld [vmem:[%s1764_s14 + $0xb] sm:$0x1] }
 0x1d3   : > { %v783_v48 = vsub.f32 %v751_v37, %v767_v5  ;;  %v774_v52 = vsub.f32 %v742_v42, %v758_v20  ;;  %v750_v24 = vmul.f32 0.0009765625, %v703_v62  ;;  %v1810_v18 = vmul.f32 0.0009765625, %v529_v29  ;;  %v820_v20 = vld [vmem:[%s1764_s14 + $0x2] sm:$0x1] }
 0x1d4   : > { %v766_v14 = vmul.f32 %v1806_v47, %v1806_v47  ;;  %1485 = vrsqrt.f32 %v791_v22  ;;  %v568_v13 = vrot.slane %v567_v54, 2  ;;  %v668_v57 = vrot.slane %v609_v41, 4 }
 0x1d5   : > { %v799_v60 = vadd.f32 1e-05, %v783_v48  ;;  %v522_v8 = vrot.slane %v1808_v33, 1  ;;  %v576_v36 = vrot.slane %v575_v6, 1  ;;  %v662_v39 = vrot.slane %v607_v32, 4 }
 0x1d6   : > { %v790_v27 = vadd.f32 1e-05, %v774_v52  ;;  %v669_v28 = vadd.f32 %v668_v57, %v609_v41  ;;  %v1816_v49 = vmul.f32 %v1478_v35, %v821_v40  ;;  %v716_v42 = vrot.slane %v625_v58, 4 }
 0x1d7   : > { %1487 = vrsqrt.f32 %v799_v60  ;;  %v782_v5 = vsub.f32 %v750_v24, %v766_v14  ;;  %v1827_v37 = vmul.f32 %v1810_v18, %v1810_v18  ;;  %v663_v62 = vadd.f32 %v662_v39, %v607_v32  ;;  %v851_v14 = vld [vmem:[%s1823_s17 + $0x1] sm:$0x1] }
 0x1d8   : > { %v710_v29 = vrot.slane %v623_v53, 4  ;;  %v1830_v35 = vadd.f32 %v568_v13, %v567_v54  ;;  %v670_v22 = vrot.slane %v669_v28, 2  ;;  %v929_v48 = vrot.slane %v1816_v49, %v1725_v7  ;;  %v828_v13 = vld [vmem:[%s1764_s14 + $0xa] sm:$0x1] }
 0x1d9   : > { %v1484_v41 = vpop.eup %1483  ;;  %v717_v52 = vadd.f32 %v716_v42, %v625_v58  ;;  %v577_v60 = vadd.f32 %v576_v36, %v575_v6  ;;  %v664_v40 = vrot.slane %v663_v62, 2  ;;  %v1834_v24 = vmul.f32 %v1482_v34, %v829_v56 }
 0x1da   : > { %v711_v57 = vadd.f32 %v710_v29, %v623_v53  ;;  %v671_v12 = vadd.f32 %v670_v22, %v669_v28  ;;  %991 = vperm.xlu1 %1467, %v929_v48   ;;  %v1838_v39 = vmul.f32 %v1799_v23, %v820_v20  ;;  %v867_v54 = vmul.f32 %v1770_v51, %v1723_v2  ;;  %v859_v23 = vld [vmem:[%s1823_s17 + $0x9] sm:$0x1] }
 0x1db   : > { %v718_v32 = vrot.slane %v717_v52, 2  ;;  %1489 = vrsqrt.f32 %v790_v27  ;;  %v665_v58 = vadd.f32 %v664_v40, %v663_v62  ;;  %v961_v34 = vrot.slane %v1834_v24, %v1725_v7  ;;  %v850_v27 = vld [vmem:[%s1823_s17] sm:$0x1]  ;;  %v831_v40 = vld [vmem:[%s1764_s14 + $0xd] sm:$0x1] }
 0x1dc   : > { %v712_v6 = vrot.slane %v711_v57, 2  ;;  %v672_v53 = vrot.slane %v671_v12, 1  ;;  %v925_v28 = vrot.slane %v1838_v39, %v1725_v7  ;;  %v883_v42 = vsub.f32 %v851_v14, %v867_v54 }
 0x1dd   : > { %v719_v36 = vadd.f32 %v718_v32, %v717_v52  ;;  %v798_v56 = vadd.f32 1e-05, %v782_v5  ;;  %v1848_v29 = vmul.f32 0.0009765625, %v577_v60  ;;  %1023 = vperm.xlu0 %1468, %v961_v34   ;;  %v1850_v2 = vmul.f32 %v1484_v41, %v828_v13 }
 0x1de   : > { %v875_v51 = vmul.f32 %v1777_v63, %v1727_v16  ;;  %v1486_v62 = vpop.eup %1485  ;;  %v673_v20 = vadd.f32 %v672_v53, %v671_v12  ;;  %v666_v22 = vrot.slane %v665_v58, 1  ;;  %987 = vperm.xlu1 %1467, %v925_v28   ;;  %v866_v52 = vmul.f32 %v1788_v26, %v1731_v31  ;;  %v858_v31 = vld [vmem:[%s1823_s17 + $0x8] sm:$0x1] }
 0x1df   : > { %v720_v48 = vrot.slane %v719_v36, 1  ;;  %v713_v60 = vadd.f32 %v712_v6, %v711_v57  ;;  %v1081_v14 = vrot.slane %v883_v42, %v1725_v7  ;;  %v957_v41 = vrot.slane %v1850_v2, %v1725_v7 }
 0x1e0   : > { %v891_v32 = vsub.f32 %v859_v23, %v875_v51  ;;  %v745_v16 = vmul.f32 0.0009765625, %v673_v20  ;;  %v882_v54 = vsub.f32 %v850_v27, %v866_v52  ;;  %v874_v12 = vmul.f32 %v1795_v0, %v1737_v61  ;;  %v853_v23 = vld [vmem:[%s1823_s17 + $0x3] sm:$0x1]  ;;  %v823_v20 = vld [vmem:[%s1764_s14 + $0x5] sm:$0x1] }
 0x1e1   : > { %v1488_v5 = vpop.eup %1487  ;;  %v721_v63 = vadd.f32 %v720_v48, %v719_v36  ;;  %v523_v13 = vadd.f32 %v522_v8, %v1808_v33  ;;  %v570_v34 = vrot.slane %v1830_v35, 1  ;;  %1143 = vperm.xlu0 %1468, %v1081_v14   ;;  %v769_v57 = vmul.f32 %v1848_v29, %v1848_v29 }
 0x1e2   : > { %v1866_v26 = vmul.f32 %v1488_v5, %v831_v40  ;;  %v777_v6 = vsub.f32 %v745_v16, %v1827_v37  ;;  %v667_v53 = vadd.f32 %v666_v22, %v665_v58  ;;  %1019 = vperm.xlu1 %1467, %v957_v41   ;;  %1491 = vrsqrt.f32 %v798_v56 }
 0x1e3   : > { %v753_v36 = vmul.f32 0.0009765625, %v721_v63  ;;  %v714_v61 = vrot.slane %v713_v60, 1  ;;  %v1113_v0 = vrot.slane %v891_v32, %v1725_v7  ;;  %v1077_v33 = vrot.slane %v882_v54, %v1725_v7  ;;  %v822_v32 = vld [vmem:[%s1764_s14 + $0x4] sm:$0x1] }
 0x1e4   : > { %v793_v8 = vadd.f32 1e-05, %v777_v6  ;;  %v890_v42 = vsub.f32 %v858_v31, %v874_v12  ;;  %v869_v51 = vmul.f32 %v1816_v49, %v1739_v25  ;;  %v1876_v37 = vmul.f32 0.0009765625, %v523_v13  ;;  %v830_v13 = vld [vmem:[%s1764_s14 + $0xc] sm:$0x1] }
 0x1e5   : > { %v785_v28 = vsub.f32 %v753_v36, %v769_v57  ;;  %v1490_v27 = vpop.eup %1489  ;;  %v571_v58 = vadd.f32 %v570_v34, %v1830_v35  ;;  %1175 = vperm.xlu0 %1468, %v1113_v0   ;;  %v969_v56 = vrot.slane %v1866_v26, %v1725_v7  ;;  %v744_v22 = vmul.f32 0.0009765625, %v667_v53  ;;  %v861_v35 = vld [vmem:[%s1823_s17 + $0xb] sm:$0x1] }
 0x1e6   : > { %1139 = vperm.xlu1 %1467, %v1077_v33   ;;  %1493 = vrsqrt.f32 %v793_v8  ;;  %v715_v52 = vadd.f32 %v714_v61, %v713_v60  ;;  %v885_v40 = vsub.f32 %v853_v23, %v869_v51  ;;  %v877_v25 = vmul.f32 %v1834_v24, %v1743_v38  ;;  %v833_v61 = vld [vmem:[%s1764_s14 + $0xf] sm:$0x1]  ;;  %v852_v33 = vld [vmem:[%s1823_s17 + $0x2] sm:$0x1]  ;;  %v825_v23 = vld [vmem:[%s1764_s14 + $0x7] sm:$0x1] }
 0x1e7   : > { %v801_v48 = vadd.f32 1e-05, %v785_v28  ;;  %v1109_v49 = vrot.slane %v890_v42, %v1725_v7  ;;  %v839_v5 = vmul.f32 %v1486_v62, %v823_v20  ;;  %v760_v14 = vmul.f32 %v1876_v37, %v1876_v37  ;;  %v855_v42 = vld [vmem:[%s1823_s17 + $0x5] sm:$0x1]  ;;  %v860_v20 = vld [vmem:[%s1823_s17 + $0xa] sm:$0x1] }
 0x1e8   : > { %v1888_v41 = vmul.f32 0.0009765625, %v571_v58  ;;  %v752_v60 = vmul.f32 0.0009765625, %v715_v52  ;;  %v1089_v63 = vrot.slane %v885_v40, %v1725_v7  ;;  %v893_v38 = vsub.f32 %v861_v35, %v877_v25  ;;  %v863_v52 = vld [vmem:[%s1823_s17 + $0xd] sm:$0x1] }
 0x1e9   : > { %1495 = vrsqrt.f32 %v801_v48  ;;  %1031 = vperm.xlu0 %1468, %v969_v56   ;;  %v776_v16 = vsub.f32 %v744_v22, %v760_v14  ;;  %v937_v24 = vrot.slane %v839_v5, %v1725_v7  ;;  %v1893_v62 = vmul.f32 %v1490_v27, %v822_v32  ;;  %v824_v14 = vld [vmem:[%s1764_s14 + $0x6] sm:$0x1] }
 0x1ea   : > { %1171 = vperm.xlu1 %1467, %v1109_v49   ;;  %v768_v12 = vmul.f32 %v1888_v41, %v1888_v41  ;;  %v1121_v57 = vrot.slane %v893_v38, %v1725_v7  ;;  %v868_v36 = vmul.f32 %v1838_v39, %v1753_v21  ;;  %v871_v8 = vmul.f32 %v839_v5, %v1772_v45  ;;  %v857_v5 = vld [vmem:[%s1823_s17 + $0x7] sm:$0x1] }
 0x1eb   : > { %v792_v34 = vadd.f32 1e-05, %v776_v16  ;;  %v933_v6 = vrot.slane %v1893_v62, %v1725_v7  ;;  %v876_v21 = vmul.f32 %v1850_v2, %v1755_v30  ;;  %v879_v48 = vmul.f32 %v1866_v26, %v1793_v46 }
 0x1ec   : > { %v1492_v54 = vpop.eup %1491  ;;  %v784_v31 = vsub.f32 %v752_v60, %v768_v12  ;;  %v884_v56 = vsub.f32 %v852_v33, %v868_v36  ;;  %v887_v22 = vsub.f32 %v855_v42, %v871_v8  ;;  %v865_v60 = vld [vmem:[%s1823_s17 + $0xf] sm:$0x1]  ;;  %v856_v42 = vld [vmem:[%s1823_s17 + $0x6] sm:$0x1] }
 0x1ed   : > { %1151 = vperm.xlu0 %1468, %v1089_v63   ;;  %v846_v53 = vmul.f32 %v1492_v54, %v830_v13  ;;  %1497 = vrsqrt.f32 %v792_v34  ;;  %v892_v25 = vsub.f32 %v860_v20, %v876_v21  ;;  %v895_v2 = vsub.f32 %v863_v52, %v879_v48  ;;  %v832_v54 = vld [vmem:[%s1764_s14 + $0xe] sm:$0x1] }
 0x1ee   : > { %999 = vperm.xlu1 %1467, %v937_v24   ;;  %v800_v51 = vadd.f32 1e-05, %v784_v31  ;;  %v1085_v40 = vrot.slane %v884_v56, %v1725_v7  ;;  %v1097_v30 = vrot.slane %v887_v22, %v1725_v7 }
 0x1ef   : > { %v965_v58 = vrot.slane %v846_v53, %v1725_v7  ;;  %v1117_v46 = vrot.slane %v892_v25, %v1725_v7  ;;  %v1129_v35 = vrot.slane %v895_v2, %v1725_v7 }
 0x1f0   : > { %v1494_v0 = vpop.eup %1493  ;;  %1499 = vrsqrt.f32 %v800_v51  ;;  %v864_v51 = vld [vmem:[%s1823_s17 + $0xe] sm:$0x1] }
 0x1f1   : > { %1183 = vperm.xlu0 %1468, %v1121_v57   ;;  %v841_v45 = vmul.f32 %v1494_v0, %v825_v23  ;;  %v854_v57 = vld [vmem:[%s1823_s17 + $0x4] sm:$0x1]  ;;  %v862_v0 = vld [vmem:[%s1823_s17 + $0xc] sm:$0x1] }
 0x1f2   : > { %995 = vperm.xlu1 %1467, %v933_v6  }
 0x1f3   : > { %v1496_v28 = vpop.eup %1495  ;;  %v873_v49 = vmul.f32 %v841_v45, %v1810_v18  ;;  %v945_v63 = vrot.slane %v841_v45, %v1725_v7 }
 0x1f4   : > { %v849_v27 = vmul.f32 %v1496_v28, %v833_v61  ;;  %v878_v61 = vmul.f32 %v846_v53, %v1806_v47 }
 0x1f5   : > { %v889_v32 = vsub.f32 %v857_v5, %v873_v49 }
 0x1f6   : > { %v977_v39 = vrot.slane %v849_v27, %v1725_v7  ;;  %1027 = vperm.xlu1 %1467, %v965_v58   ;;  %v881_v16 = vmul.f32 %v849_v27, %v1848_v29  ;;  %v870_v29 = vmul.f32 %v1893_v62, %v1784_v15  ;;  %v894_v8 = vsub.f32 %v862_v0, %v878_v61 }
 0x1f7   : > { %v1498_v26 = vpop.eup %1497  ;;  %v1105_v24 = vrot.slane %v889_v32, %v1725_v7 }
 0x1f8   : > { %1039 = vperm.xlu0 %1468, %v977_v39   ;;  %v840_v18 = vmul.f32 %v1498_v26, %v824_v14  ;;  %v897_v12 = vsub.f32 %v865_v60, %v881_v16  ;;  %v886_v36 = vsub.f32 %v854_v57, %v870_v29  ;;  %v1125_v15 = vrot.slane %v894_v8, %v1725_v7 }
 0x1fa   : > { %1147 = vperm.xlu1 %1467, %v1085_v40   ;;  %v1500_v38 = vpop.eup %1499  ;;  %v941_v13 = vrot.slane %v840_v18, %v1725_v7  ;;  %v1137_v31 = vrot.slane %v897_v12, %v1725_v7  ;;  %v1093_v33 = vrot.slane %v886_v36, %v1725_v7  ;;  %v872_v28 = vmul.f32 %v840_v18, %v1876_v37 }
 0x1fb   : > { %v848_v34 = vmul.f32 %v1500_v38, %v832_v54 }
 0x1fc   : > { %1159 = vperm.xlu0 %1468, %v1097_v30   ;;  %v888_v62 = vsub.f32 %v856_v42, %v872_v28 }
 0x1fd   : > { %v973_v6 = vrot.slane %v848_v34, %v1725_v7  ;;  %v880_v23 = vmul.f32 %v848_v34, %v1888_v41 }
 0x1fe   : > { %1179 = vperm.xlu1 %1467, %v1117_v46   ;;  %v1101_v27 = vrot.slane %v888_v62, %v1725_v7  ;;  %v1998_v62 = vld [vmem:[#allocation2_spill] sm:$0xff] }
 0x1ff   : > { %v896_v47 = vsub.f32 %v864_v51, %v880_v23 }
 0x200   : > { %1191 = vperm.xlu0 %1468, %v1129_v35  }
 0x201   : > { %v1133_v53 = vrot.slane %v896_v47, %v1725_v7 }
 0x202   : > { %1007 = vperm.xlu1 %1467, %v945_v63  }
 0x204   : > { %1167 = vperm.xlu0 %1468, %v1105_v24  }
 0x206   : > { %1003 = vperm.xlu1 %1467, %v941_v13  }
 0x208   : > { %1199 = vperm.xlu0 %1468, %v1137_v31  }
 0x20a   : > { %1035 = vperm.xlu1 %1467, %v973_v6  }
 0x20e   : > { %1155 = vperm.xlu1 %1467, %v1093_v33  }
 0x212   : > { %1187 = vperm.xlu1 %1467, %v1125_v15  }
 0x216   : > { %1163 = vperm.xlu1 %1467, %v1101_v27   ;;  %v1999_v27 = vld [vmem:[#allocation3_spill] sm:$0xff] }
 0x21a   : > { %1195 = vperm.xlu1 %1467, %v1133_v53  }
 0x243   : > { %v984_v58 = vpop.permute.xlu1 %983 }
 0x244   : > { %v1043_v45 = vmul.f32 %v984_v58, %v1628_v43  ;;  %v2000_v58 = vld [vmem:[#allocation4_spill] sm:$0xff] }
 0x247   : > { %v1016_v56 = vpop.permute.xlu0 %1015 }
 0x248   : > { %v1051_v52 = vmul.f32 %v1016_v56, %v1631_v44 }
 0x24b   : > { %v980_v21 = vpop.permute.xlu0 %979 }
 0x24c   : > { %v1042_v40 = vmul.f32 %v980_v21, %v1638_v50 }
 0x24d   : > { %v1012_v37 = vpop.permute.xlu1 %1011 }
 0x24e   : > { %v1050_v49 = vmul.f32 %v1012_v37, %v1642_v55 }
 0x259   : > { %v992_v39 = vpop.permute.xlu1 %991 }
 0x25a   : > { %v1045_v35 = vmul.f32 %v992_v39, %v1647_v59 }
 0x25c   : > { %v1024_v20 = vpop.permute.xlu0 %1023 }
 0x25d   : > { %v988_v22 = vpop.permute.xlu1 %987  ;;  %v1053_v50 = vmul.f32 %v1024_v20, %v1653_v1 }
 0x25e   : > { %v1044_v38 = vmul.f32 %v988_v22, %v1660_v3 }
 0x260   : > { %v1144_v7 = vpop.permute.xlu0 %1143 }
 0x261   : > { %v1020_v41 = vpop.permute.xlu1 %1019  ;;  %v1203_v48 = vadd.f32 %v1144_v7, %v1043_v45 }
 0x262   : > { %v1052_v1 = vmul.f32 %v1020_v41, %v1663_v4 }
 0x263   : > { %1219 = vst [vmem:[%s1950_s21 + $0x8] sm:$0xff] %v1203_v48 }
 0x264   : > { %v1176_v25 = vpop.permute.xlu0 %1175 }
 0x265   : > { %v1140_v43 = vpop.permute.xlu1 %1139  ;;  %v1211_v30 = vadd.f32 %v1176_v25, %v1051_v52 }
 0x266   : > { %v1202_v2 = vadd.f32 %v1140_v43, %v1042_v40 }
 0x267   : > { %1227 = vst [vmem:[%s1950_s21 + $0x48] sm:$0xff] %v1211_v30 }
 0x268   : > { %1218 = vst [vmem:[%s1950_s21] sm:$0xff] %v1202_v2  ;;  %v1032_v5 = vpop.permute.xlu0 %1031 }
 0x269   : > { %v1172_v46 = vpop.permute.xlu1 %1171  ;;  %v1055_v34 = vmul.f32 %v1032_v5, %v1682_v11 }
 0x26a   : > { %v1210_v26 = vadd.f32 %v1172_v46, %v1050_v49 }
 0x26c   : > { %1226 = vst [vmem:[%s1950_s21 + $0x40] sm:$0xff] %v1210_v26  ;;  %v1152_v44 = vpop.permute.xlu0 %1151 }
 0x26d   : > { %v1000_v14 = vpop.permute.xlu1 %999  ;;  %v1205_v32 = vadd.f32 %v1152_v44, %v1045_v35 }
 0x26e   : > { %v1047_v59 = vmul.f32 %v1000_v14, %v1676_v9 }
 0x26f   : > { %1221 = vst [vmem:[%s1950_s21 + $0x18] sm:$0xff] %v1205_v32 }
 0x270   : > { %v1184_v16 = vpop.permute.xlu0 %1183 }
 0x271   : > { %v996_v60 = vpop.permute.xlu1 %995  ;;  %v1213_v63 = vadd.f32 %v1184_v16, %v1053_v50 }
 0x272   : > { %v1046_v28 = vmul.f32 %v996_v60, %v1679_v10 }
 0x273   : > { %1229 = vst [vmem:[%s1950_s21 + $0x58] sm:$0xff] %v1213_v63 }
 0x275   : > { %v1028_v55 = vpop.permute.xlu1 %1027 }
 0x276   : > { %v1054_v23 = vmul.f32 %v1028_v55, %v1998_v62 }
 0x277   : > { %v1040_v18 = vpop.permute.xlu0 %1039 }
 0x278   : > { %v1057_v4 = vmul.f32 %v1040_v18, %v1706_v19 }
 0x279   : > { %v1148_v24 = vpop.permute.xlu1 %1147 }
 0x27a   : > { %v1204_v54 = vadd.f32 %v1148_v24, %v1044_v38 }
 0x27b   : > { %v1160_v12 = vpop.permute.xlu0 %1159 }
 0x27c   : > { %v1207_v13 = vadd.f32 %v1160_v12, %v1047_v59  ;;  %1220 = vst [vmem:[%s1950_s21 + $0x10] sm:$0xff] %v1204_v54 }
 0x27d   : > { %v1180_v29 = vpop.permute.xlu1 %1179 }
 0x27e   : > { %1223 = vst [vmem:[%s1950_s21 + $0x28] sm:$0xff] %v1207_v13  ;;  %v1212_v31 = vadd.f32 %v1180_v29, %v1052_v1 }
 0x27f   : > { %v1192_v57 = vpop.permute.xlu0 %1191 }
 0x280   : > { %v1215_v6 = vadd.f32 %v1192_v57, %v1055_v34  ;;  %1228 = vst [vmem:[%s1950_s21 + $0x50] sm:$0xff] %v1212_v31 }
 0x281   : > { %v1008_v3 = vpop.permute.xlu1 %1007 }
 0x282   : > { %1231 = vst [vmem:[%s1950_s21 + $0x68] sm:$0xff] %v1215_v6  ;;  %v1049_v9 = vmul.f32 %v1008_v3, %v1700_v17 }
 0x283   : > { %v1168_v36 = vpop.permute.xlu0 %1167 }
 0x284   : > { %v1209_v61 = vadd.f32 %v1168_v36, %v1049_v9 }
 0x285   : > { %v1004_v0 = vpop.permute.xlu1 %1003 }
 0x286   : > { %1225 = vst [vmem:[%s1950_s21 + $0x38] sm:$0xff] %v1209_v61  ;;  %v1048_v47 = vmul.f32 %v1004_v0, %v1999_v27 }
 0x287   : > { %v1200_v11 = vpop.permute.xlu0 %1199 }
 0x288   : > { %v1217_v33 = vadd.f32 %v1200_v11, %v1057_v4 }
 0x289   : > { %v1036_v8 = vpop.permute.xlu1 %1035 }
 0x28a   : > { %1233 = vst [vmem:[%s1950_s21 + $0x78] sm:$0xff] %v1217_v33  ;;  %v1056_v56 = vmul.f32 %v1036_v8, %v2000_v58 }
 0x28d   : > { %v1156_v42 = vpop.permute.xlu1 %1155 }
 0x28e   : > { %v1206_v15 = vadd.f32 %v1156_v42, %v1046_v28 }
 0x290   : > { %1222 = vst [vmem:[%s1950_s21 + $0x20] sm:$0xff] %v1206_v15 }
 0x291   : > { %v1188_v17 = vpop.permute.xlu1 %1187 }
 0x292   : > { %v1214_v51 = vadd.f32 %v1188_v17, %v1054_v23 }
 0x294   : > { %1230 = vst [vmem:[%s1950_s21 + $0x60] sm:$0xff] %v1214_v51 }
 0x295   : > { %v1164_v19 = vpop.permute.xlu1 %1163 }
 0x296   : > { %v1208_v53 = vadd.f32 %v1164_v19, %v1048_v47 }
 0x298   : > { %1224 = vst [vmem:[%s1950_s21 + $0x30] sm:$0xff] %v1208_v53 }
 0x299   : > { %v1196_v37 = vpop.permute.xlu1 %1195 }
 0x29a   : > { %v1216_v21 = vadd.f32 %v1196_v37, %v1056_v56 }
 0x29c   : > { %1232 = vst [vmem:[%s1950_s21 + $0x70] sm:$0xff] %v1216_v21 }
 0x29d PF: > { %s15_s18 = sadd.s32 1, %s1507_s18  }
 0x29e   : > { %p12_p4 = scmp.ge.s32.totalorder %s15_s18, 4  }
 0x2a0   :  { %14 = sbr.rel (!%p12_p4) target bundleno = 1 (0x1), region = 76 }

</bundles_post_ra>
